<compile_context>
chip_gen: v6e
topology: v6e:2x2x1
jax: 0.10.0
libtpu: 0.0.40
codegen_flags: <defaults>
</compile_context>

<pallas_src>
import math

import jax
import jax.numpy as jnp
from jax.experimental import pallas as pl
from jax.experimental.pallas import tpu as pltpu

TB = 128      # batch tile (rows per grid step)
K_PAD = 32    # padded fc1 contraction dim: 18 features + 1 ones-col (fc1 bias) + zero pad
H1 = 256
H2 = 32
N_PAD = 128   # lane-dense padded logits width (n_actions=9 lives in the first columns)


def mlp_kernel(x_ref, w1_ref, w2_ref, b2_ref, w3_ref, b3_ref, o_ref):
    # x_ref : (TB, K_PAD)  bf16  -- flattened sample + ones column + zero pad
    # w1_ref: (K_PAD, H1)  bf16  -- fc1 weight with fc1 bias folded into the ones row
    # w2_ref: (H1, H2)     bf16 ; b2_ref: (1, H2)    f32
    # w3_ref: (H2, N_PAD)  bf16 ; b3_ref: (1, N_PAD) f32 (zero padded to lane width)
    # o_ref : (TB, N_PAD)  f32
    h1 = jnp.dot(x_ref[...], w1_ref[...], preferred_element_type=jnp.float32)
    h1 = jnp.maximum(h1, 0.0).astype(jnp.bfloat16)            # relu in f32, bf16 for next MXU op
    h2 = jnp.dot(h1, w2_ref[...], preferred_element_type=jnp.float32) + b2_ref[...]
    h2 = jnp.maximum(h2, 0.0).astype(jnp.bfloat16)
    o_ref[...] = jnp.dot(h2, w3_ref[...], preferred_element_type=jnp.float32) + b3_ref[...]


def _pallas_mlp(x_aug, w1a, w2, b2, w3p, b3p):
    bp = x_aug.shape[0]                      # padded batch, multiple of TB
    const = lambda i: (0, 0)                 # weights stay resident across all grid steps
    return pl.pallas_call(
        mlp_kernel,
        out_shape=jax.ShapeDtypeStruct((bp, N_PAD), jnp.float32),
        grid=(bp // TB,),
        in_specs=[
            pl.BlockSpec((TB, K_PAD), lambda i: (i, 0)),
            pl.BlockSpec((K_PAD, H1), const),
            pl.BlockSpec((H1, H2), const),
            pl.BlockSpec((1, H2), const),
            pl.BlockSpec((H2, N_PAD), const),
            pl.BlockSpec((1, N_PAD), const),
        ],
        out_specs=pl.BlockSpec((TB, N_PAD), lambda i: (i, 0)),
        compiler_params=pltpu.CompilerParams(dimension_semantics=("parallel",)),
    )(x_aug, w1a, w2, b2, w3p, b3p)


def prepare_params(params):
    """One-time host-side prep: fold fc1 bias, zero-pad to TPU-friendly shapes, cast to bf16."""
    w1, b1, w2, b2, w3, b3 = params          # weights: (in, out) f32, biases: (1, out) f32
    in_features = w1.shape[0]
    n_actions = w3.shape[1]
    assert in_features + 1 <= K_PAD and n_actions <= N_PAD

    w1a = jnp.zeros((K_PAD, H1), jnp.float32)
    w1a = w1a.at[:in_features].set(w1).at[in_features].set(b1[0])   # bias row hit by ones col
    w3p = jnp.zeros((H2, N_PAD), jnp.float32).at[:, :n_actions].set(w3)
    b3p = jnp.zeros((1, N_PAD), jnp.float32).at[:, :n_actions].set(b3)

    return dict(
        w1a=w1a.astype(jnp.bfloat16),
        w2=w2.astype(jnp.bfloat16),
        b2=b2.astype(jnp.float32),
        w3p=w3p.astype(jnp.bfloat16),
        b3p=b3p,
        in_features=in_features,
        n_actions=n_actions,
    )


def classic_net_forward_batch(xs, prep):
    """xs: (B, *sample_shape) where each sample flattens to in_features.
    Returns (B, n_actions) f32 logits."""
    in_features = prep["in_features"]
    n_actions = prep["n_actions"]
    b = xs.shape[0]
    x2 = jnp.reshape(xs, (b, in_features)).astype(jnp.float32)   # per-sample torch.flatten

    # Augment: [features | 1.0 (fc1 bias) | zero pad to K_PAD], then pad rows to TB multiple.
    ones_col = jnp.ones((b, 1), jnp.float32)
    zpad = jnp.zeros((b, K_PAD - in_features - 1), jnp.float32)
    x_aug = jnp.concatenate([x2, ones_col, zpad], axis=1)
    bp = pl.cdiv(b, TB) * TB
    if bp != b:
        x_aug = jnp.pad(x_aug, ((0, bp - b), (0, 0)))

    out = _pallas_mlp(x_aug.astype(jnp.bfloat16), prep["w1a"], prep["w2"],
                      prep["b2"], prep["w3p"], prep["b3p"])
    return out[:b, :n_actions]


def classic_net_forward(x, prep):
    """Unbatched forward matching the original module (flatten whole x -> logits vector)."""
    return classic_net_forward_batch(x[None], prep)[0]


def init_params(key, input_shape=(3, 3, 2), n_actions=9):
    # Match the module exactly: fc1 in = input_shape[0] if 1-D else 2 * H * W.
    if len(input_shape) == 1:
        in_features = input_shape[0]
    else:
        in_features = 2 * input_shape[0] * input_shape[1]

    def linear_init(k, fan_in, fan_out):
        kw, kb = jax.random.split(k)
        bound = 1.0 / math.sqrt(fan_in)
        w = jax.random.uniform(kw, (fan_in, fan_out), jnp.float32, -bound, bound)
        b = jax.random.uniform(kb, (1, fan_out), jnp.float32, -bound, bound)
        return w, b

    k1, k2, k3 = jax.random.split(key, 3)
    w1, b1 = linear_init(k1, in_features, H1)
    w2, b2 = linear_init(k2, H1, H2)
    w3, b3 = linear_init(k3, H2, n_actions)
    return (w1, b1, w2, b2, w3, b3)


def reference_forward_batch(xs, params):
    w1, b1, w2, b2, w3, b3 = params
    v = jnp.reshape(xs, (xs.shape[0], -1)).astype(jnp.float32)
    h1 = jnp.maximum(v @ w1 + b1, 0.0)
    h2 = jnp.maximum(h1 @ w2 + b2, 0.0)
    return h2 @ w3 + b3


if __name__ == "__main__":
    key = jax.random.PRNGKey(0)
    k_params, k_x = jax.random.split(key)

    input_shape = (3, 3, 2)   # module default: fc1 in = 2*3*3 = 18
    n_actions = 9

    params = init_params(k_params, input_shape, n_actions)
    prep = prepare_params(params)

    # Batched run exercising a multi-step grid (130 rows -> 2 tiles of TB=128).
    batch = 130
    xs = jax.random.normal(k_x, (batch,) + input_shape, jnp.float32)
    y = classic_net_forward_batch(xs, prep)
    jax.block_until_ready(y)

    y_ref = reference_forward_batch(xs, params)
    assert y.shape == (batch, n_actions)
    assert jnp.allclose(y, y_ref, atol=5e-2, rtol=5e-2), (
        "batched mismatch, max abs err = %f" % float(jnp.max(jnp.abs(y - y_ref))))

    # Single-sample path (exact semantics of the original module's forward).
    y1 = classic_net_forward(xs[0], prep)
    jax.block_until_ready(y1)
    assert y1.shape == (n_actions,)
    assert jnp.allclose(y1, y_ref[0], atol=5e-2, rtol=5e-2), "single-sample mismatch"

    print("KERNEL_OK")
</pallas_src>

<mosaic_0001>
module attributes {stable_mosaic.version = 11 : i64} {
  func.func @mlp_kernel(%arg0: i32, %arg1: memref<128x32xbf16, #tpu.memory_space<vmem>>, %arg2: memref<32x256xbf16, #tpu.memory_space<vmem>>, %arg3: memref<256x32xbf16, #tpu.memory_space<vmem>>, %arg4: memref<1x32xf32, #tpu.memory_space<vmem>>, %arg5: memref<32x128xbf16, #tpu.memory_space<vmem>>, %arg6: memref<1x128xf32, #tpu.memory_space<vmem>>, %arg7: memref<128x128xf32, #tpu.memory_space<vmem>>) attributes {dimension_semantics = [#tpu.dimension_semantics<parallel>], iteration_bounds = array<i64: 2>, scalar_prefetch = 0 : i64, scratch_operands = 0 : i64, tpu.core_type = #tpu.core_type<tc>, window_params = [{transform_indices = @transform_0, window_bounds = array<i64: 128, 32>}, {pipeline_mode = #tpu.pipeline_mode<synchronous>, transform_indices = @transform_1, window_bounds = array<i64: 32, 256>}, {pipeline_mode = #tpu.pipeline_mode<synchronous>, transform_indices = @transform_2, window_bounds = array<i64: 256, 32>}, {pipeline_mode = #tpu.pipeline_mode<synchronous>, transform_indices = @transform_3, window_bounds = array<i64: 1, 32>}, {pipeline_mode = #tpu.pipeline_mode<synchronous>, transform_indices = @transform_4, window_bounds = array<i64: 32, 128>}, {pipeline_mode = #tpu.pipeline_mode<synchronous>, transform_indices = @transform_5, window_bounds = array<i64: 1, 128>}, {transform_indices = @transform_6, window_bounds = array<i64: 128, 128>}]} {
    %c0 = arith.constant 0 : index
    %c0_0 = arith.constant 0 : index
    %0 = vector.load %arg1[%c0, %c0_0] : memref<128x32xbf16, #tpu.memory_space<vmem>>, vector<128x32xbf16>
    %c0_1 = arith.constant 0 : index
    %c0_2 = arith.constant 0 : index
    %1 = vector.load %arg2[%c0_1, %c0_2] : memref<32x256xbf16, #tpu.memory_space<vmem>>, vector<32x256xbf16>
    %cst = arith.constant dense<0.000000e+00> : vector<128x256xf32>
    %2 = tpu.matmul %0, %1, %cst {dimension_numbers = #tpu.dot_dimension_numbers<[1], [0], [0], [1], [0, 0, 1, 1], [], []>} : vector<128x32xbf16>, vector<32x256xbf16>, vector<128x256xf32> -> vector<128x256xf32>
    %cst_3 = arith.constant 0.000000e+00 : f32
    %3 = vector.broadcast %cst_3 : f32 to vector<128x256xf32>
    %4 = arith.maximumf %2, %3 : vector<128x256xf32>
    %5 = arith.truncf %4 : vector<128x256xf32> to vector<128x256xbf16>
    %c0_4 = arith.constant 0 : index
    %c0_5 = arith.constant 0 : index
    %6 = vector.load %arg3[%c0_4, %c0_5] : memref<256x32xbf16, #tpu.memory_space<vmem>>, vector<256x32xbf16>
    %cst_6 = arith.constant dense<0.000000e+00> : vector<128x32xf32>
    %7 = tpu.matmul %5, %6, %cst_6 {dimension_numbers = #tpu.dot_dimension_numbers<[1], [0], [0], [1], [0, 0, 1, 1], [], []>} : vector<128x256xbf16>, vector<256x32xbf16>, vector<128x32xf32> -> vector<128x32xf32>
    %c0_7 = arith.constant 0 : index
    %c0_8 = arith.constant 0 : index
    %8 = vector.load %arg4[%c0_7, %c0_8] : memref<1x32xf32, #tpu.memory_space<vmem>>, vector<1x32xf32>
    %9 = vector.broadcast %8 : vector<1x32xf32> to vector<128x32xf32>
    %10 = arith.addf %7, %9 : vector<128x32xf32>
    %cst_9 = arith.constant 0.000000e+00 : f32
    %11 = vector.broadcast %cst_9 : f32 to vector<128x32xf32>
    %12 = arith.maximumf %10, %11 : vector<128x32xf32>
    %13 = arith.truncf %12 : vector<128x32xf32> to vector<128x32xbf16>
    %c0_10 = arith.constant 0 : index
    %c0_11 = arith.constant 0 : index
    %14 = vector.load %arg5[%c0_10, %c0_11] : memref<32x128xbf16, #tpu.memory_space<vmem>>, vector<32x128xbf16>
    %cst_12 = arith.constant dense<0.000000e+00> : vector<128x128xf32>
    %15 = tpu.matmul %13, %14, %cst_12 {dimension_numbers = #tpu.dot_dimension_numbers<[1], [0], [0], [1], [0, 0, 1, 1], [], []>} : vector<128x32xbf16>, vector<32x128xbf16>, vector<128x128xf32> -> vector<128x128xf32>
    %c0_13 = arith.constant 0 : index
    %c0_14 = arith.constant 0 : index
    %16 = vector.load %arg6[%c0_13, %c0_14] : memref<1x128xf32, #tpu.memory_space<vmem>>, vector<1x128xf32>
    %17 = vector.broadcast %16 : vector<1x128xf32> to vector<128x128xf32>
    %18 = arith.addf %15, %17 : vector<128x128xf32>
    %c0_15 = arith.constant 0 : index
    %c0_16 = arith.constant 0 : index
    %19 = vector.load %arg7[%c0_15, %c0_16] : memref<128x128xf32, #tpu.memory_space<vmem>>, vector<128x128xf32>
    tpu.vector_store %arg7[%c0_15, %c0_16], %18 {strides = array<i32>} : memref<128x128xf32, #tpu.memory_space<vmem>>, vector<128x128xf32>,
    return
  }
  func.func @transform_0(%arg0: i32) -> (i32, i32) {
    %c0_i32 = arith.constant 0 : i32
    %c0_i32_0 = arith.constant 0 : i32
    return %arg0, %c0_i32 : i32, i32
  }
  func.func @transform_1(%arg0: i32) -> (i32, i32) {
    %c0_i32 = arith.constant 0 : i32
    %c0_i32_0 = arith.constant 0 : i32
    %c0_i32_1 = arith.constant 0 : i32
    return %c0_i32, %c0_i32_0 : i32, i32
  }
  func.func @transform_2(%arg0: i32) -> (i32, i32) {
    %c0_i32 = arith.constant 0 : i32
    %c0_i32_0 = arith.constant 0 : i32
    %c0_i32_1 = arith.constant 0 : i32
    return %c0_i32, %c0_i32_0 : i32, i32
  }
  func.func @transform_3(%arg0: i32) -> (i32, i32) {
    %c0_i32 = arith.constant 0 : i32
    %c0_i32_0 = arith.constant 0 : i32
    %c0_i32_1 = arith.constant 0 : i32
    return %c0_i32, %c0_i32_0 : i32, i32
  }
  func.func @transform_4(%arg0: i32) -> (i32, i32) {
    %c0_i32 = arith.constant 0 : i32
    %c0_i32_0 = arith.constant 0 : i32
    %c0_i32_1 = arith.constant 0 : i32
    return %c0_i32, %c0_i32_0 : i32, i32
  }
  func.func @transform_5(%arg0: i32) -> (i32, i32) {
    %c0_i32 = arith.constant 0 : i32
    %c0_i32_0 = arith.constant 0 : i32
    %c0_i32_1 = arith.constant 0 : i32
    return %c0_i32, %c0_i32_0 : i32, i32
  }
  func.func @transform_6(%arg0: i32) -> (i32, i32) {
    %c0_i32 = arith.constant 0 : i32
    %c0_i32_0 = arith.constant 0 : i32
    return %arg0, %c0_i32 : i32, i32
  }
}

</mosaic_0001>

<bundles_post_ra>
// kernel: tpu_custom_call.1
= control target key start
LH: loop header
LB: loop body
LE: loop exit
PB: predicated region body
PF: predicated region fallthrough
CT: control target
= control target key end

     0   :  { %11 = vsyncpa [#allocation3], 0  ;;  %s1582_s0 = inlined_call_operand.vmem [shape: bf16[256,32], index: 0, kind: input, shape index: {}]   ;;  %s1583_s1 = inlined_call_operand.vmem [shape: bf16[32,256], index: 1, kind: input, shape index: {}]   ;;  %s1584_s2 = inlined_call_operand.vmem [shape: bf16[256,32], index: 2, kind: input, shape index: {}]   ;;  %s1585_s3 = inlined_call_operand.vmem [shape: f32[1,32], index: 3, kind: input, shape index: {}]   ;;  %s1586_s4 = inlined_call_operand.vmem [shape: bf16[32,128], index: 4, kind: input, shape index: {}]   ;;  %s1587_s5 = inlined_call_operand.vmem [shape: f32[1,128], index: 5, kind: input, shape index: {}]   ;;  %s1588_s6 = inlined_call_operand.hbm [shape: f32[256,128], index: 6, kind: output, shape index: {}]  }
   0x1   :  { %13 = vsyncpa [#allocation3 + $0x1], 0  ;;  %s1342_s21 = smov 0   ;;  %s1344_s22 = smov 0  }
   0x2   :  { %s1346_s23 = smov 0   ;;  %s1348_s24 = smov 0  }
   0x3 LB: > { %s1363_s25 = sadd.s32 4294967295, %s1301_s24   ;;  %s1012_s26 = sadd.s32 4294967294, %s1301_s24   ;;  %s1301_s24 = sphi %s1348_s24, %s1594_s24   ;;  %s1297_s23 = sphi %s1346_s23, %s1593_s23   ;;  %s1293_s22 = sphi %s1344_s22, %s1592_s22   ;;  %s1289_s21 = sphi %s1342_s21, %s1591_s21  }
   0x4   : > { %s1367_s27 = sadd.s32 1, %s1301_s24   ;;  %s157_s28 = sadd.s32 1, %s1297_s23 }
   0x5   : > { %s154_s29 = ssub.s32 %s1301_s24, %s1367_s27  ;;  %p167_p0 = scmp.ne.s32.totalorder %s1297_s23, %s1293_s22 }
   0x6   : > { %p155_p1 = scmp.eq.s32.totalorder %s154_s29, 0  ;;  %p168_p2 = scmp.eq.s32.totalorder %s1363_s25, 1 }
   0x7   : > { %p173_p3 = scmp.ne.s32.totalorder %s1293_s22, %s1289_s21  ;;  %p174_p4 = scmp.eq.s32.totalorder %s1012_s26, 1 }
   0x8   : > { %s1378_s30 = scalar_select %p155_p1, %s1297_s23, %s157_s28  }
   0x9   : > { %p1380_p5 = por %p168_p2, %p167_p0  ;;  %p1384_p6 = por %p174_p4, %p173_p3 }
   0xa   : > { %p1015_p7 = scmp.ge.s32.totalorder %s1301_s24, 1  ;;  %p216_p8 = scmp.lt.s32.totalorder %s1301_s24, 3 }
   0xc   : > { %p217_p9 = pnand %p1015_p7, %p216_p8 }
   0xd   : > { %s1017_s11 = sshll.u32 (!%p217_p9), %s1363_s25, 4  ;;  %s243_s16 = sand.u32 (!%p217_p9), 1, %s1293_s22  }
   0xe   : > { %220 = sbr.rel (%p217_p9) target bundleno = 710 (0x2c6), region = 44  ;;  %p247_p10 = scmp.lt.s32.totalorder (!%p217_p9), %s1017_s11, 31 }
   0xf   : > { %s1016_s17 = sshll.u32 (!%p217_p9), %s243_s16, 7  ;;  %s1304_s12 = smov (!%p217_p9), [#allocation2]  }
  0x10   : > { %s1513_s20 = scalar_lea.vmem (!%p217_p9), [#allocation2], %s1016_s17  ;;  %s1245_s14 = sshll.u32 (!%p217_p9), %s1304_s12, 4  ;;  %s1246_s14 = int_to_ptr.vmem [resolvable:$false] %s1245_s14 }
  0x11   : > { %s950_s26 = sshll.u32 (!%p217_p9), %s1513_s20, 4  ;;  %s1247_s15 = scalar_lea.vmem (!%p217_p9), %s1246_s14, 4096  ;;  %s1536_s26 = int_to_ptr.vmem [resolvable:$true] %s950_s26 }
  0x12   : > { %s1241_s10 = scalar_lea.vmem (!%p217_p9), %s1536_s26, 2048  ;;  %p1248_p0 = scmp.lt.s32.totalorder (!%p217_p9), %s1536_s26, %s1246_s14 }
  0x13   : > { %v1209_v0 = vld [vmem:[%s1583_s1 + $0x14] ss:$8 sps:$4 sm:$0xff]   ;;  %v1211_v1 = vld [vmem:[%s1583_s1 + $0x10] ss:$8 sps:$4 sm:$0xff]   ;;  %v1303_v2 = vmov 0   ;;  %s1596_s11 = smov (!%p247_p10, %s1017_s11), 31  ;;  %p1242_p11 = scmp.ne.s32.totalorder %s1536_s26, %s1241_s10 }
  0x14   : > { %391 = vmatprep.mubr.bf16.mxu0 %v1303_v2  ;;  %371 = vmatprep.subr.bf16.mxu0 %v1209_v0  ;;  %v1212_v3 = vld [vmem:[%s1583_s1 + $0x4] ss:$8 sps:$4 sm:$0xff]   ;;  %v1214_v4 = vld [vmem:[%s1583_s1] ss:$8 sps:$4 sm:$0xff]   ;;  %v1223_v5 = vld [vmem:[%s1584_s2 + $0x78] sm:$0xff]   ;;  %s1018_s28 = sshll.u32 %s1596_s11, 2  ;;  %p1249_p1 = scmp.lt.s32.totalorder %s1247_s15, %s1241_s10 }
  0x15   : > { %372 = vmatpush1.bf16.msra.mxu0 %v1211_v1  ;;  %v1224_v6 = vld [vmem:[%s1584_s2 + $0x38] sm:$0xff]   ;;  %1073 = vmatprep.subr.bf16.mxu1 %v1223_v5  ;;  %v1225_v7 = vld [vmem:[%s1584_s2 + $0x70] sm:$0xff]   ;;  %s1415_s13 = scalar_lea.vmem %s1582_s0, %s1018_s28  ;;  %vm334_vm0 = vcmask 261120   ;;  %v1227_v11 = vld [vmem:[%s1584_s2 + $0x68] sm:$0xff]   ;;  %p1243_p12 = pnand %p1242_p11, %p1380_p5 }
  0x16   : > { %373 = vmatprep.subr.bf16.mxu0 %v1212_v3  ;;  %1074 = vmatpush3.bf16.msra.mxu1 %v1224_v6  ;;  %v1226_v8 = vld [vmem:[%s1584_s2 + $0x30] sm:$0xff]   ;;  %v1215_v9 = vld [vmem:[%s1415_s13] sm:$0xff]   ;;  %v1216_v10 = vld [vmem:[%s1415_s13 + $0x8] sm:$0xff]   ;;  %p1250_p2 = por %p1249_p1, %p1248_p0 }
  0x17   : > { %1075 = vmatprep.subr.bf16.mxu1 %v1225_v7  ;;  %v1228_v12 = vld [vmem:[%s1584_s2 + $0x28] sm:$0xff]   ;;  %v1229_v13 = vld [vmem:[%s1584_s2 + $0x60] sm:$0xff]   ;;  %v1231_v15 = vld [vmem:[%s1584_s2 + $0x58] sm:$0xff]   ;;  %p1244_p13 = pneg %p1243_p12 }
  0x18   : > { %v1230_v14 = vld [vmem:[%s1584_s2 + $0x20] sm:$0xff]   ;;  %v1217_v16 = vld [vmem:[%s1415_s13 + $0x10] sm:$0xff]   ;;  %v1232_v17 = vld [vmem:[%s1584_s2 + $0x18] sm:$0xff]  }
  0x19   : > { %374 = vmatpush1.bf16.msra.mxu0 %v1214_v4  ;;  %v1218_v18 = vld [vmem:[%s1415_s13 + $0x18] sm:$0xff]   ;;  %v1219_v19 = vld [vmem:[%s1415_s13 + $0x20] sm:$0xff]   ;;  %v1220_v20 = vld [vmem:[%s1415_s13 + $0x28] sm:$0xff]   ;;  %p1251_p3 = pnand %p1250_p2, %p1244_p13 }
  0x1a   : > { %1076 = vmatpush3.bf16.msra.mxu1 %v1226_v8  ;;  %v1221_v21 = vld [vmem:[%s1415_s13 + $0x30] sm:$0xff]   ;;  %v1222_v22 = vld [vmem:[%s1415_s13 + $0x38] sm:$0xff]   ;;  %v1235_v25 = vld [vmem:[%s1584_s2 + $0x48] sm:$0xff]   ;;  %s1072_s13 = sshll.u32 %s1363_s25, 11  ;;  %s1542_s25 = scalar_lea.sflag [#allocation3], %s243_s16 }
  0x1b   : > { %1077 = vmatprep.subr.bf16.mxu1 %v1227_v11  ;;  %v1233_v23 = vld [vmem:[%s1584_s2 + $0x50] sm:$0xff]   ;;  %v1236_v26 = vld [vmem:[%s1584_s2 + $0x8] sm:$0xff]   ;;  %v1237_v27 = vld [vmem:[%s1584_s2 + $0x40] sm:$0xff]   ;;  %s1534_s9 = scalar_lea.hbm %s1588_s6, %s1072_s13 }
  0x1c   : > { %1031 = vmatmul.mubr.msk.bf16.vlgmr.msra.gmra.mxu0 %vm334_vm0, %v1215_v9  ;;  %v1234_v24 = vld [vmem:[%s1584_s2 + $0x10] sm:$0xff]   ;;  %v1238_v28 = vld [vmem:[%s1584_s2] sm:$0xff]   ;;  %v1239_v29 = vld [vmem:[%s1586_s4 + $0x8] sm:$0xff]  }
  0x1d   : > { %401 = vmatprep.mubr.bf16.mxu0 %v1303_v2  ;;  %1147 = vmatprep.subr.bf16.mxu0 %v1239_v29 }
  0x1e   : > { %1078 = vmatpush3.bf16.msra.mxu1 %v1228_v12  ;;  %1148 = vmatpush3.bf16.msra.mxu0 %v1239_v29 }
  0x1f   : > { %1079 = vmatprep.subr.bf16.mxu1 %v1229_v13 }
  0x22   : > { %1080 = vmatpush3.bf16.msra.mxu1 %v1230_v14 }
  0x23   : > { %1081 = vmatprep.subr.bf16.mxu1 %v1231_v15 }
  0x24   : > { %1032 = vmatmul.mubr.msk.bf16.gmra.mxu0 %vm334_vm0, %v1216_v10 }
  0x25   : > { %411 = vmatprep.mubr.bf16.mxu0 %v1303_v2 }
  0x26   : > { %1082 = vmatpush3.bf16.msra.mxu1 %v1232_v17 }
  0x27   : > { %1083 = vmatprep.subr.bf16.mxu1 %v1233_v23 }
  0x2a   : > { %1084 = vmatpush3.bf16.msra.mxu1 %v1234_v24 }
  0x2b   : > { %1085 = vmatprep.subr.bf16.mxu1 %v1235_v25 }
  0x2c   : > { %1033 = vmatmul.mubr.msk.bf16.gmra.mxu0 %vm334_vm0, %v1217_v16 }
  0x2d   : > { %421 = vmatprep.mubr.bf16.mxu0 %v1303_v2 }
  0x2e   : > { %1086 = vmatpush3.bf16.msra.mxu1 %v1236_v26 }
  0x2f   : > { %1087 = vmatprep.subr.bf16.mxu1 %v1237_v27 }
  0x32   : > { %1088 = vmatpush3.bf16.msra.mxu1 %v1238_v28 }
  0x34   : > { %1034 = vmatmul.mubr.msk.bf16.gmra.mxu0 %vm334_vm0, %v1218_v18 }
  0x35   : > { %431 = vmatprep.mubr.bf16.mxu0 %v1303_v2 }
  0x3c   : > { %1035 = vmatmul.mubr.msk.bf16.gmra.mxu0 %vm334_vm0, %v1219_v19 }
  0x3d   : > { %441 = vmatprep.mubr.bf16.mxu0 %v1303_v2 }
  0x44   : > { %1036 = vmatmul.mubr.msk.bf16.gmra.mxu0 %vm334_vm0, %v1220_v20 }
  0x45   : > { %451 = vmatprep.mubr.bf16.mxu0 %v1303_v2 }
  0x4c   : > { %1037 = vmatmul.mubr.msk.bf16.gmra.mxu0 %vm334_vm0, %v1221_v21 }
  0x4d   : > { %461 = vmatprep.mubr.bf16.mxu0 %v1303_v2 }
  0x54   : > { %1038 = vmatmul.mubr.msk.bf16.gmra.mxu0 %vm334_vm0, %v1222_v22 }
  0xdc   : > { %v393_v30 = vpop.f32.mrf.mxu0 }
  0xdd   : > { %v472_v37 = vmax.f32 %v393_v30, 0.0 }
  0xde   : > { %v395_v31 = vpop.f32.mrf.mxu0 }
  0xdf   : > { %v473_v35 = vmax.f32 %v395_v31, 0.0 }
  0xe0   : > { %v397_v32 = vpop.f32.mrf.mxu0 }
  0xe1   : > { %v474_v33 = vmax.f32 %v397_v32, 0.0 }
  0xe2   : > { %v399_v34 = vpop.f32.mrf.mxu0 }
  0xe3   : > { %v475_v36 = vmax.f32 %v399_v34, 0.0  ;;  %v504_v40 = vpack.c.bf16 %v474_v33, %v472_v37 }
  0xe4   : > { %v403_v38 = vpop.f32.mrf.mxu0 }
  0xe5   : > { %v505_v39 = vpack.c.bf16 %v475_v36, %v473_v35  ;;  %v476_v47 = vmax.f32 %v403_v38, 0.0 }
  0xe6   : > { %v405_v41 = vpop.f32.mrf.mxu0 }
  0xe7   : > { %687 = vmatprep.mubr.bf16.mxu1 %v505_v39  ;;  %v477_v45 = vmax.f32 %v405_v41, 0.0 }
  0xe8   : > { %v407_v42 = vpop.f32.mrf.mxu0  ;;  %688 = vmatmul.mubr.bf16.vlgmr.msra.gmra.mxu1 %v504_v40 }
  0xe9   : > { %v478_v43 = vmax.f32 %v407_v42, 0.0 }
  0xea   : > { %v409_v44 = vpop.f32.mrf.mxu0 }
  0xeb   : > { %v479_v46 = vmax.f32 %v409_v44, 0.0  ;;  %v506_v50 = vpack.c.bf16 %v478_v43, %v476_v47 }
  0xec   : > { %v413_v48 = vpop.f32.mrf.mxu0 }
  0xed   : > { %v507_v49 = vpack.c.bf16 %v479_v46, %v477_v45  ;;  %v480_v57 = vmax.f32 %v413_v48, 0.0  ;;  %v1240_v46 = vld [vmem:[%s1586_s4] sm:$0xff]  }
  0xee   : > { %v415_v51 = vpop.f32.mrf.mxu0  ;;  %1149 = vmatprep.subr.bf16.mxu0 %v1240_v46 }
  0xef   : > { %695 = vmatprep.mubr.bf16.mxu1 %v507_v49  ;;  %v481_v55 = vmax.f32 %v415_v51, 0.0  ;;  %1150 = vmatpush3.bf16.msra.mxu0 %v1240_v46 }
  0xf0   : > { %v417_v52 = vpop.f32.mrf.mxu0  ;;  %696 = vmatmul.mubr.bf16.gmra.mxu1 %v506_v50  ;;  %v1481_v50 = vld [vmem:[%s1585_s3] ss:$0 sm:$0xff] }
  0xf1   : > { %v482_v53 = vmax.f32 %v417_v52, 0.0 }
  0xf2   : > { %v419_v54 = vpop.f32.mrf.mxu0 }
  0xf3   : > { %v483_v56 = vmax.f32 %v419_v54, 0.0  ;;  %v508_v60 = vpack.c.bf16 %v482_v53, %v480_v57 }
  0xf4   : > { %v423_v58 = vpop.f32.mrf.mxu0 }
  0xf5   : > { %v509_v59 = vpack.c.bf16 %v483_v56, %v481_v55  ;;  %v484_v3 = vmax.f32 %v423_v58, 0.0 }
  0xf6   : > { %v425_v61 = vpop.f32.mrf.mxu0 }
  0xf7   : > { %703 = vmatprep.mubr.bf16.mxu1 %v509_v59  ;;  %v485_v1 = vmax.f32 %v425_v61, 0.0 }
  0xf8   : > { %v427_v62 = vpop.f32.mrf.mxu0  ;;  %704 = vmatmul.mubr.bf16.gmra.mxu1 %v508_v60 }
  0xf9   : > { %v486_v63 = vmax.f32 %v427_v62, 0.0 }
  0xfa   : > { %v429_v0 = vpop.f32.mrf.mxu0 }
  0xfb   : > { %v487_v2 = vmax.f32 %v429_v0, 0.0  ;;  %v510_v6 = vpack.c.bf16 %v486_v63, %v484_v3 }
  0xfc   : > { %v433_v4 = vpop.f32.mrf.mxu0 }
  0xfd   : > { %v511_v5 = vpack.c.bf16 %v487_v2, %v485_v1  ;;  %v488_v13 = vmax.f32 %v433_v4, 0.0 }
  0xfe   : > { %v435_v7 = vpop.f32.mrf.mxu0 }
  0xff   : > { %711 = vmatprep.mubr.bf16.mxu1 %v511_v5  ;;  %v489_v11 = vmax.f32 %v435_v7, 0.0 }
 0x100   : > { %v437_v8 = vpop.f32.mrf.mxu0  ;;  %712 = vmatmul.mubr.bf16.gmra.mxu1 %v510_v6 }
 0x101   : > { %v490_v9 = vmax.f32 %v437_v8, 0.0 }
 0x102   : > { %v439_v10 = vpop.f32.mrf.mxu0 }
 0x103   : > { %v491_v12 = vmax.f32 %v439_v10, 0.0  ;;  %v512_v16 = vpack.c.bf16 %v490_v9, %v488_v13 }
 0x104   : > { %v443_v14 = vpop.f32.mrf.mxu0 }
 0x105   : > { %v513_v15 = vpack.c.bf16 %v491_v12, %v489_v11  ;;  %v492_v23 = vmax.f32 %v443_v14, 0.0 }
 0x106   : > { %v445_v17 = vpop.f32.mrf.mxu0 }
 0x107   : > { %719 = vmatprep.mubr.bf16.mxu1 %v513_v15  ;;  %v493_v21 = vmax.f32 %v445_v17, 0.0 }
 0x108   : > { %v447_v18 = vpop.f32.mrf.mxu0  ;;  %720 = vmatmul.mubr.bf16.gmra.mxu1 %v512_v16 }
 0x109   : > { %v494_v19 = vmax.f32 %v447_v18, 0.0 }
 0x10a   : > { %v449_v20 = vpop.f32.mrf.mxu0 }
 0x10b   : > { %v495_v22 = vmax.f32 %v449_v20, 0.0  ;;  %v514_v26 = vpack.c.bf16 %v494_v19, %v492_v23 }
 0x10c   : > { %v453_v24 = vpop.f32.mrf.mxu0 }
 0x10d   : > { %v515_v25 = vpack.c.bf16 %v495_v22, %v493_v21  ;;  %v496_v33 = vmax.f32 %v453_v24, 0.0 }
 0x10e   : > { %v455_v27 = vpop.f32.mrf.mxu0 }
 0x10f   : > { %727 = vmatprep.mubr.bf16.mxu1 %v515_v25  ;;  %v497_v31 = vmax.f32 %v455_v27, 0.0 }
 0x110   : > { %v457_v28 = vpop.f32.mrf.mxu0  ;;  %728 = vmatmul.mubr.bf16.gmra.mxu1 %v514_v26 }
 0x111   : > { %v498_v29 = vmax.f32 %v457_v28, 0.0 }
 0x112   : > { %v459_v30 = vpop.f32.mrf.mxu0 }
 0x113   : > { %v499_v32 = vmax.f32 %v459_v30, 0.0  ;;  %v516_v36 = vpack.c.bf16 %v498_v29, %v496_v33 }
 0x114   : > { %v463_v34 = vpop.f32.mrf.mxu0 }
 0x115   : > { %v517_v35 = vpack.c.bf16 %v499_v32, %v497_v31  ;;  %v500_v43 = vmax.f32 %v463_v34, 0.0 }
 0x116   : > { %v465_v37 = vpop.f32.mrf.mxu0 }
 0x117   : > { %735 = vmatprep.mubr.bf16.mxu1 %v517_v35  ;;  %v501_v41 = vmax.f32 %v465_v37, 0.0 }
 0x118   : > { %v467_v38 = vpop.f32.mrf.mxu0  ;;  %736 = vmatmul.mubr.bf16.gmra.mxu1 %v516_v36 }
 0x119   : > { %v502_v39 = vmax.f32 %v467_v38, 0.0 }
 0x11a   : > { %v469_v40 = vpop.f32.mrf.mxu0 }
 0x11b   : > { %v503_v42 = vmax.f32 %v469_v40, 0.0  ;;  %v518_v45 = vpack.c.bf16 %v502_v39, %v500_v43 }
 0x11d   : > { %v519_v44 = vpack.c.bf16 %v503_v42, %v501_v41 }
 0x11f   : > { %743 = vmatprep.mubr.bf16.mxu1 %v519_v44 }
 0x120   : > { %744 = vmatmul.mubr.bf16.gmra.mxu1 %v518_v45 }
 0x1a8   : > { %v1089_v47 = vpop.f32.mrf.mxu1 }
 0x1aa   : > { %v1090_v48 = vpop.f32.mrf.mxu1 }
 0x1ab   : > { %v1091_v49 = vadd.f32 %v1090_v48, %v1089_v47 }
 0x1ac   : > { %v1092_v51 = vpop.f32.mrf.mxu1 }
 0x1ad   : > { %v690_v53 = vadd.f32 %v1091_v49, %v1481_v50 }
 0x1ae   : > { %v1093_v52 = vpop.f32.mrf.mxu1 }
 0x1af   : > { %v1094_v54 = vadd.f32 %v1093_v52, %v1092_v51  ;;  %v752_v58 = vmax.f32 %v690_v53, 0.0 }
 0x1b0   : > { %v1095_v55 = vpop.f32.mrf.mxu1 }
 0x1b1   : > { %v693_v56 = vadd.f32 %v1094_v54, %v1481_v50 }
 0x1b2   : > { %v1096_v57 = vpop.f32.mrf.mxu1 }
 0x1b3   : > { %v753_v59 = vmax.f32 %v693_v56, 0.0  ;;  %v1097_v60 = vadd.f32 %v1096_v57, %v1095_v55 }
 0x1b4   : > { %v1098_v61 = vpop.f32.mrf.mxu1 }
 0x1b5   : > { %v768_v62 = vpack.c.bf16 %v753_v59, %v752_v58  ;;  %v698_v0 = vadd.f32 %v1097_v60, %v1481_v50 }
 0x1b6   : > { %v1099_v63 = vpop.f32.mrf.mxu1 }
 0x1b7   : > { %v1100_v1 = vadd.f32 %v1099_v63, %v1098_v61  ;;  %1151 = vmatprep.mubr.msk.bf16.mxu0 %vm334_vm0, %v768_v62  ;;  %v754_v5 = vmax.f32 %v698_v0, 0.0 }
 0x1b8   : > { %v1101_v2 = vpop.f32.mrf.mxu1 }
 0x1b9   : > { %v701_v3 = vadd.f32 %v1100_v1, %v1481_v50 }
 0x1ba   : > { %v1102_v4 = vpop.f32.mrf.mxu1 }
 0x1bb   : > { %v755_v6 = vmax.f32 %v701_v3, 0.0  ;;  %v1103_v7 = vadd.f32 %v1102_v4, %v1101_v2 }
 0x1bc   : > { %v1104_v8 = vpop.f32.mrf.mxu1 }
 0x1bd   : > { %v769_v9 = vpack.c.bf16 %v755_v6, %v754_v5  ;;  %v706_v11 = vadd.f32 %v1103_v7, %v1481_v50 }
 0x1be   : > { %v1105_v10 = vpop.f32.mrf.mxu1 }
 0x1bf   : > { %v1106_v12 = vadd.f32 %v1105_v10, %v1104_v8  ;;  %1152 = vmatmul.mubr.msk.bf16.vlgmr.msra.gmra.mxu0 %vm334_vm0, %v769_v9  ;;  %v756_v16 = vmax.f32 %v706_v11, 0.0  ;;  %v1056_v9 = vld [vmem:[%s1587_s5] ss:$0 sm:$0xff] }
 0x1c0   : > { %v1107_v13 = vpop.f32.mrf.mxu1 }
 0x1c1   : > { %v709_v14 = vadd.f32 %v1106_v12, %v1481_v50 }
 0x1c2   : > { %v1108_v15 = vpop.f32.mrf.mxu1 }
 0x1c3   : > { %v757_v17 = vmax.f32 %v709_v14, 0.0  ;;  %v1109_v18 = vadd.f32 %v1108_v15, %v1107_v13 }
 0x1c4   : > { %v1110_v19 = vpop.f32.mrf.mxu1 }
 0x1c5   : > { %v770_v20 = vpack.c.bf16 %v757_v17, %v756_v16  ;;  %v714_v22 = vadd.f32 %v1109_v18, %v1481_v50 }
 0x1c6   : > { %v1111_v21 = vpop.f32.mrf.mxu1 }
 0x1c7   : > { %v1112_v23 = vadd.f32 %v1111_v21, %v1110_v19  ;;  %1155 = vmatprep.mubr.msk.bf16.mxu0 %vm334_vm0, %v770_v20  ;;  %v758_v27 = vmax.f32 %v714_v22, 0.0 }
 0x1c8   : > { %v1113_v24 = vpop.f32.mrf.mxu1 }
 0x1c9   : > { %v717_v25 = vadd.f32 %v1112_v23, %v1481_v50 }
 0x1ca   : > { %v1114_v26 = vpop.f32.mrf.mxu1 }
 0x1cb   : > { %v759_v28 = vmax.f32 %v717_v25, 0.0  ;;  %v1115_v29 = vadd.f32 %v1114_v26, %v1113_v24 }
 0x1cc   : > { %v1116_v30 = vpop.f32.mrf.mxu1 }
 0x1cd   : > { %v771_v31 = vpack.c.bf16 %v759_v28, %v758_v27  ;;  %v722_v33 = vadd.f32 %v1115_v29, %v1481_v50 }
 0x1ce   : > { %v1117_v32 = vpop.f32.mrf.mxu1 }
 0x1cf   : > { %v1118_v34 = vadd.f32 %v1117_v32, %v1116_v30  ;;  %1156 = vmatmul.mubr.msk.bf16.gmra.mxu0 %vm334_vm0, %v771_v31  ;;  %v760_v38 = vmax.f32 %v722_v33, 0.0 }
 0x1d0   : > { %v1119_v35 = vpop.f32.mrf.mxu1 }
 0x1d1   : > { %v725_v36 = vadd.f32 %v1118_v34, %v1481_v50 }
 0x1d2   : > { %v1120_v37 = vpop.f32.mrf.mxu1 }
 0x1d3   : > { %v761_v39 = vmax.f32 %v725_v36, 0.0  ;;  %v1121_v40 = vadd.f32 %v1120_v37, %v1119_v35 }
 0x1d4   : > { %v1122_v41 = vpop.f32.mrf.mxu1 }
 0x1d5   : > { %v772_v42 = vpack.c.bf16 %v761_v39, %v760_v38  ;;  %v730_v44 = vadd.f32 %v1121_v40, %v1481_v50 }
 0x1d6   : > { %v1123_v43 = vpop.f32.mrf.mxu1 }
 0x1d7   : > { %v1124_v45 = vadd.f32 %v1123_v43, %v1122_v41  ;;  %1159 = vmatprep.mubr.msk.bf16.mxu0 %vm334_vm0, %v772_v42  ;;  %v762_v49 = vmax.f32 %v730_v44, 0.0 }
 0x1d8   : > { %v1125_v46 = vpop.f32.mrf.mxu1 }
 0x1d9   : > { %v733_v47 = vadd.f32 %v1124_v45, %v1481_v50 }
 0x1da   : > { %v1126_v48 = vpop.f32.mrf.mxu1 }
 0x1db   : > { %v763_v51 = vmax.f32 %v733_v47, 0.0  ;;  %v1127_v52 = vadd.f32 %v1126_v48, %v1125_v46 }
 0x1dc   : > { %v1128_v53 = vpop.f32.mrf.mxu1 }
 0x1dd   : > { %v773_v54 = vpack.c.bf16 %v763_v51, %v762_v49  ;;  %v738_v56 = vadd.f32 %v1127_v52, %v1481_v50 }
 0x1de   : > { %v1129_v55 = vpop.f32.mrf.mxu1 }
 0x1df   : > { %v1130_v57 = vadd.f32 %v1129_v55, %v1128_v53  ;;  %1160 = vmatmul.mubr.msk.bf16.gmra.mxu0 %vm334_vm0, %v773_v54  ;;  %v764_v61 = vmax.f32 %v738_v56, 0.0 }
 0x1e0   : > { %v1131_v58 = vpop.f32.mrf.mxu1 }
 0x1e1   : > { %v741_v59 = vadd.f32 %v1130_v57, %v1481_v50 }
 0x1e2   : > { %v1132_v60 = vpop.f32.mrf.mxu1 }
 0x1e3   : > { %v765_v62 = vmax.f32 %v741_v59, 0.0  ;;  %v1133_v63 = vadd.f32 %v1132_v60, %v1131_v58 }
 0x1e4   : > { %v1134_v0 = vpop.f32.mrf.mxu1 }
 0x1e5   : > { %v774_v1 = vpack.c.bf16 %v765_v62, %v764_v61  ;;  %v746_v3 = vadd.f32 %v1133_v63, %v1481_v50 }
 0x1e6   : > { %v1135_v2 = vpop.f32.mrf.mxu1 }
 0x1e7   : > { %v1136_v4 = vadd.f32 %v1135_v2, %v1134_v0  ;;  %1163 = vmatprep.mubr.msk.bf16.mxu0 %vm334_vm0, %v774_v1  ;;  %v766_v6 = vmax.f32 %v746_v3, 0.0 }
 0x1e9   : > { %v749_v5 = vadd.f32 %v1136_v4, %v1481_v50 }
 0x1eb   : > { %v767_v7 = vmax.f32 %v749_v5, 0.0 }
 0x1ed   : > { %v775_v8 = vpack.c.bf16 %v767_v7, %v766_v6 }
 0x1ef   : > { %1164 = vmatmul.mubr.msk.bf16.gmra.mxu0 %vm334_vm0, %v775_v8 }
 0x27f   : > { %v1153_v10 = vpop.f32.mrf.mxu0 }
 0x280   : > { %v866_v11 = vadd.f32 %v1153_v10, %v1056_v9 }
 0x281   : > { %v857_v12 = vpop.f32.mrf.mxu0 }
 0x282   : > { %922 = vst [vmem:[%s1513_s20 + $0x10] sm:$0xff] %v866_v11  ;;  %v858_v50 = vadd.f32 %v1056_v9, %v857_v12 }
 0x283   : > { %v1154_v13 = vpop.f32.mrf.mxu0 }
 0x284   : > { %920 = vst [vmem:[%s1513_s20] sm:$0xff] %v858_v50  ;;  %v869_v14 = vadd.f32 %v1154_v13, %v1056_v9 }
 0x285   : > { %v860_v15 = vpop.f32.mrf.mxu0 }
 0x286   : > { %923 = vst [vmem:[%s1513_s20 + $0x18] sm:$0xff] %v869_v14  ;;  %v861_v16 = vadd.f32 %v1056_v9, %v860_v15 }
 0x288   : > { %921 = vst [vmem:[%s1513_s20 + $0x8] sm:$0xff] %v861_v16 }
 0x28f   : > { %v1157_v17 = vpop.f32.mrf.mxu0 }
 0x290   : > { %v882_v18 = vadd.f32 %v1157_v17, %v1056_v9 }
 0x291   : > { %v873_v19 = vpop.f32.mrf.mxu0 }
 0x292   : > { %926 = vst [vmem:[%s1513_s20 + $0x30] sm:$0xff] %v882_v18  ;;  %v874_v20 = vadd.f32 %v1056_v9, %v873_v19 }
 0x293   : > { %v1158_v21 = vpop.f32.mrf.mxu0 }
 0x294   : > { %924 = vst [vmem:[%s1513_s20 + $0x20] sm:$0xff] %v874_v20  ;;  %v885_v22 = vadd.f32 %v1158_v21, %v1056_v9 }
 0x295   : > { %v876_v23 = vpop.f32.mrf.mxu0 }
 0x296   : > { %927 = vst [vmem:[%s1513_s20 + $0x38] sm:$0xff] %v885_v22  ;;  %v877_v24 = vadd.f32 %v1056_v9, %v876_v23 }
 0x298   : > { %925 = vst [vmem:[%s1513_s20 + $0x28] sm:$0xff] %v877_v24 }
 0x29f   : > { %v1161_v25 = vpop.f32.mrf.mxu0 }
 0x2a0   : > { %v898_v26 = vadd.f32 %v1161_v25, %v1056_v9 }
 0x2a1   : > { %v889_v27 = vpop.f32.mrf.mxu0 }
 0x2a2   : > { %930 = vst [vmem:[%s1513_s20 + $0x50] sm:$0xff] %v898_v26  ;;  %v890_v28 = vadd.f32 %v1056_v9, %v889_v27 }
 0x2a3   : > { %v1162_v29 = vpop.f32.mrf.mxu0 }
 0x2a4   : > { %928 = vst [vmem:[%s1513_s20 + $0x40] sm:$0xff] %v890_v28  ;;  %v901_v30 = vadd.f32 %v1162_v29, %v1056_v9 }
 0x2a5   : > { %v892_v31 = vpop.f32.mrf.mxu0 }
 0x2a6   : > { %931 = vst [vmem:[%s1513_s20 + $0x58] sm:$0xff] %v901_v30  ;;  %v893_v32 = vadd.f32 %v1056_v9, %v892_v31 }
 0x2a8   : > { %929 = vst [vmem:[%s1513_s20 + $0x48] sm:$0xff] %v893_v32 }
 0x2af   : > { %v1165_v33 = vpop.f32.mrf.mxu0 }
 0x2b0   : > { %v914_v34 = vadd.f32 %v1165_v33, %v1056_v9 }
 0x2b1   : > { %v905_v35 = vpop.f32.mrf.mxu0 }
 0x2b2   : > { %934 = vst [vmem:[%s1513_s20 + $0x70] sm:$0xff] %v914_v34  ;;  %v906_v36 = vadd.f32 %v1056_v9, %v905_v35 }
 0x2b3   : > { %v1166_v37 = vpop.f32.mrf.mxu0 }
 0x2b4   : > { %932 = vst [vmem:[%s1513_s20 + $0x60] sm:$0xff] %v906_v36  ;;  %v917_v38 = vadd.f32 %v1166_v37, %v1056_v9 }
 0x2b5   : > { %v908_v39 = vpop.f32.mrf.mxu0 }
 0x2b6   : > { %935 = vst [vmem:[%s1513_s20 + $0x78] sm:$0xff] %v917_v38  ;;  %v909_v40 = vadd.f32 %v1056_v9, %v908_v39 }
 0x2b8   : > { %933 = vst [vmem:[%s1513_s20 + $0x68] sm:$0xff] %v909_v40 }
 0x2b9   : > { %1254 = shalt.err (!%p1251_p3)
}
 0x2ba   : > { %s1255_s11 = scalar_lea.hbm %s1534_s9, 2048  ;;  %s1259_s18 = scalar_lea.hbm %s1588_s6, 4096 }
 0x2bb   : > { %p1256_p4 = scmp.ne.s32.totalorder %s1534_s9, %s1255_s11  ;;  %p1260_p9 = scmp.lt.s32.totalorder %s1534_s9, %s1588_s6 }
 0x2bc   : > { %p1261_p10 = scmp.lt.s32.totalorder %s1259_s18, %s1255_s11 }
 0x2bd   : > { %p1257_p7 = pnand %p1256_p4, %p1380_p5 }
 0x2be   : > { %p1262_p11 = por %p1261_p10, %p1260_p9 }
 0x2bf   : > { %p1258_p8 = pneg %p1257_p7 }
 0x2c1   : > { %p1263_p12 = pnand %p1262_p11, %p1258_p8 }
 0x2c3   : > { %1266 = shalt.err (!%p1263_p12)
}
 0x2c4   : > { %s1305_s13 = smov 128   ;;  %s1306_s28 = smov 8  }
 0x2c5   : > { %1167 = dma.vmem_to_hbm [thread:$0]  (%p1380_p5), %s1536_s26, 2048, %s1534_s9, %s1542_s25, %s1305_s13, %s1305_s13, %s1306_s28  }
 0x2c6 PF: > { %p1173_p13 = scmp.ge.s32.totalorder %s1301_s24, 2  ;;  %s965_s29 = sand.u32 1, %s1289_s21  }
 0x2c7   : > { %s966_s10 = scalar_lea.sflag [#allocation3], %s965_s29 }
 0x2c8   : > { %p1170_p0 = pnand %p1173_p13, %p1384_p6 }
 0x2ca   : > { %p1171_p1 = pneg %p1170_p0 }
 0x2cc   : > { %1284 = dma.done.wait (%p1171_p1), %s966_s10, 2048  }
 0x2cd   : > { %1286 = vsyncadd (%p1171_p1), %s966_s10, 4294965248  ;;  %p16_p2 = scmp.ge.s32.totalorder %s1367_s27, 4   ;;  %s1591_s21 = smov %s1293_s22 }
 0x2ce   : > { %s1592_s22 = smov %s1297_s23  ;;  %s1593_s23 = smov %s1378_s30 }
 0x2cf   : > { %s1594_s24 = smov %s1367_s27  ;;  %18 = sbr.rel (!%p16_p2) target bundleno = 3 (0x3), region = 79 }
 0x2d4   :  { %971 = vsyncpa [#allocation3], 1 }
 0x2d5   :  { %973 = vsyncpa [#allocation3 + $0x1], 1 }

</bundles_post_ra>
